<compile_context>
chip_gen: v7x
topology: tpu7x:2x2x1
jax: 0.10.0
libtpu: 0.0.40
codegen_flags: <defaults>
</compile_context>

<pallas_src>
import functools

import jax
import jax.numpy as jnp
from jax import lax
from jax.experimental import pallas as pl
from jax.experimental.pallas import tpu as pltpu

LN_EPS = 1e-5  # PyTorch nn.LayerNorm default


def _mlp_predictor_kernel(x_ref, w1_ref, b1_ref, w2_ref, b2_ref, o_ref, *,
                          compute_dtype):
    # x_ref:  (bm, in_feats)      w1_ref: (in_feats, hidden)  b1_ref: (1, hidden)
    # w2_ref: (hidden, n_tasks)   b2_ref: (1, n_tasks)        o_ref:  (bm, n_tasks)
    x = x_ref[...]

    # Linear 1 (MXU) + bias, ReLU.  Cast operands to compute_dtype (bf16 by
    # default) only at the dot boundary; accumulate in f32.
    h = jnp.dot(x.astype(compute_dtype), w1_ref[...].astype(compute_dtype),
                preferred_element_type=jnp.float32)
    h = jnp.maximum(h + b1_ref[...], 0.0)

    # LayerNorm over the hidden (last) dim, biased variance (PyTorch
    # semantics); all LN math in f32 (v5e has no bf16 VPU/EUP).  The affine
    # (gamma, beta) is pre-folded into w2_ref / b2_ref (see prepare_params).
    mean = jnp.mean(h, axis=-1, keepdims=True)
    centered = h - mean
    var = jnp.mean(centered * centered, axis=-1, keepdims=True)
    normed = centered * lax.rsqrt(var + LN_EPS)

    # Linear 2 (MXU) + bias (LN affine folded in).
    out = jnp.dot(normed.astype(compute_dtype),
                  w2_ref[...].astype(compute_dtype),
                  preferred_element_type=jnp.float32)
    o_ref[...] = (out + b2_ref[...]).astype(o_ref.dtype)


def prepare_params(w1, b1, gamma, beta, w2, b2):
    """One-time parameter preprocessing (model-load time, NOT per call).

    * PyTorch nn.Linear stores W as (out, in); pre-transpose for x @ W.
    * Fold the LayerNorm affine into the second linear (exact algebra):
        (normed * gamma + beta) @ W2^T + b2
          == normed @ (gamma[:, None] * W2^T) + (beta @ W2^T + b2)
    * Lift 1-D biases to (1, n) rows for lane layout.
    """
    w1 = jnp.asarray(w1, jnp.float32)
    b1 = jnp.asarray(b1, jnp.float32)
    gamma = jnp.asarray(gamma, jnp.float32)
    beta = jnp.asarray(beta, jnp.float32)
    w2 = jnp.asarray(w2, jnp.float32)
    b2 = jnp.asarray(b2, jnp.float32)

    hidden = w1.shape[0]
    n_tasks = w2.shape[0]

    w1_t = w1.T                       # (in_feats, hidden)
    w2_t = w2.T                       # (hidden, n_tasks)
    w2_fold = gamma[:, None] * w2_t   # LN scale folded in (f32)
    b2_fold = beta @ w2_t + b2        # LN shift folded in (f32)

    return (w1_t,
            b1.reshape(1, hidden),
            w2_fold,
            b2_fold.reshape(1, n_tasks))


def _round_up(x, m):
    return ((x + m - 1) // m) * m


@functools.lru_cache(maxsize=1)
def _tpu_generation_hints():
    """Best-effort (tensorcores_per_chip, per-kernel VMEM budget in bytes)."""
    num_tc = 1                 # v5e / v6e: single TensorCore per chip
    vmem_budget = 20 << 20     # safely under every generation's scoped default
    try:
        kind = jax.devices()[0].device_kind.lower()
    except Exception:  # pragma: no cover - non-TPU / query failure
        kind = ""
    if "v7" in kind:
        num_tc = 2             # v7x: 2 TCs/chip, only 64 MiB physical VMEM
        vmem_budget = 16 << 20
    return num_tc, vmem_budget


def _pick_block_m(batch, requested, num_tc, bytes_per_row, vmem_budget):
    """Choose the batch tile.

    Big tiles amortize the ~0.35us/grid-step overhead; a conservative VMEM cap
    keeps double-buffered feats/out tiles plus (bm, hidden) temporaries under
    budget on every generation (v7x has half the VMEM of v5e/v6e).  On
    multi-TC chips the step count is rounded to a multiple of the core count
    so the "parallel" axis load-balances; single-TC chips keep one big tile.
    """
    cap = max(8, (vmem_budget // max(bytes_per_row, 1)) // 8 * 8)
    bm = min(_round_up(max(requested, 8), 8), cap, _round_up(batch, 8))
    bm = max(bm, 8)
    if num_tc > 1 and batch > 8 * num_tc:
        # bm only shrinks / steps only grow across passes, so this settles.
        for _ in range(2):
            steps = _round_up(pl.cdiv(batch, bm), num_tc)
            bm = max(8, _round_up(pl.cdiv(batch, steps), 8))
    return bm


@functools.partial(jax.jit, static_argnames=("block_m", "compute_dtype"))
def mlp_predictor(feats, w1_t, b1, w2_fold, b2_fold, *, block_m=8192,
                  compute_dtype=jnp.bfloat16):
    """feats: [B, in_feats] f32 -> [B, n_tasks] f32.

    Parameter args must come from `prepare_params` (already transposed,
    LN-affine folded, 2-D) so no per-call preprocessing ops are emitted.
    """
    B, in_feats = feats.shape
    hidden = w1_t.shape[1]
    n_tasks = w2_fold.shape[1]

    num_tc, vmem_budget = _tpu_generation_hints()
    # Per-row VMEM estimate: double-buffered feats + out tiles (f32) plus ~6
    # hidden-wide f32 temporaries (h / centered / normed / casts) kept live.
    bytes_per_row = (2 * in_feats + 2 * n_tasks + 6 * hidden) * 4
    bm = _pick_block_m(B, block_m, num_tc, bytes_per_row, vmem_budget)
    grid = (pl.cdiv(B, bm),)

    kernel = functools.partial(_mlp_predictor_kernel,
                               compute_dtype=compute_dtype)

    cost = pl.CostEstimate(
        flops=2 * B * (in_feats * hidden + hidden * n_tasks),
        transcendentals=B,  # one rsqrt per row
        bytes_accessed=4 * (B * (in_feats + n_tasks)
                            + in_feats * hidden + hidden
                            + hidden * n_tasks + n_tasks),
    )

    return pl.pallas_call(
        kernel,
        out_shape=jax.ShapeDtypeStruct((B, n_tasks), feats.dtype),
        grid_spec=pltpu.PrefetchScalarGridSpec(
            num_scalar_prefetch=0,
            grid=grid,
            in_specs=[
                # feats is the only operand that changes per grid step.
                pl.BlockSpec((bm, in_feats), lambda i: (i, 0)),
                # weights / biases stay resident (block (0, 0)).
                pl.BlockSpec((in_feats, hidden), lambda i: (0, 0)),
                pl.BlockSpec((1, hidden), lambda i: (0, 0)),
                pl.BlockSpec((hidden, n_tasks), lambda i: (0, 0)),
                pl.BlockSpec((1, n_tasks), lambda i: (0, 0)),
            ],
            out_specs=pl.BlockSpec((bm, n_tasks), lambda i: (i, 0)),
        ),
        compiler_params=pltpu.CompilerParams(
            dimension_semantics=("parallel",),
        ),
        cost_estimate=cost,
    )(feats, w1_t, b1, w2_fold, b2_fold)


def _reference(feats, w1, b1, gamma, beta, w2, b2):
    h = feats @ w1.T + b1
    h = jnp.maximum(h, 0.0)
    mean = jnp.mean(h, axis=-1, keepdims=True)
    var = jnp.mean((h - mean) ** 2, axis=-1, keepdims=True)
    h = (h - mean) / jnp.sqrt(var + LN_EPS) * gamma + beta
    return h @ w2.T + b2


if __name__ == "__main__":
    in_feats, hidden_feats, n_tasks = 32, 64, 4

    key = jax.random.PRNGKey(0)
    k_x, k_x2, k_w1, k_b1, k_g, k_bt, k_w2, k_b2 = jax.random.split(key, 8)

    # Deterministic parameter init (PyTorch-style uniform fan-in bounds).
    bound1 = 1.0 / (in_feats ** 0.5)
    w1 = jax.random.uniform(k_w1, (hidden_feats, in_feats), jnp.float32,
                            -bound1, bound1)
    b1 = jax.random.uniform(k_b1, (hidden_feats,), jnp.float32, -bound1, bound1)
    # Non-trivial LN affine so the gamma/beta -> (W2, b2) fold is exercised.
    gamma = 1.0 + 0.1 * jax.random.normal(k_g, (hidden_feats,), jnp.float32)
    beta = 0.1 * jax.random.normal(k_bt, (hidden_feats,), jnp.float32)
    bound2 = 1.0 / (hidden_feats ** 0.5)
    w2 = jax.random.uniform(k_w2, (n_tasks, hidden_feats), jnp.float32,
                            -bound2, bound2)
    b2 = jax.random.uniform(k_b2, (n_tasks,), jnp.float32, -bound2, bound2)

    # One-time preprocessing, hoisted out of the per-call path.
    params = jax.block_until_ready(prepare_params(w1, b1, gamma, beta, w2, b2))

    # Case 1: small batch, full-f32 dots -> tight check vs. the reference.
    B = 8
    feats = jax.random.normal(k_x, (B, in_feats), dtype=jnp.float32)
    out_f32 = jax.block_until_ready(
        mlp_predictor(feats, *params, compute_dtype=jnp.float32))
    ref = _reference(feats, w1, b1, gamma, beta, w2, b2)
    assert out_f32.shape == (B, n_tasks)
    assert jnp.allclose(out_f32, ref, atol=1e-4, rtol=1e-4), "f32 mismatch (B=8)"

    # Case 2: larger batch, default bf16-at-the-dot perf path; exercises a
    # multi-step grid on v7x and a partially-filled last tile (masked store).
    B2 = 200
    feats2 = jax.random.normal(k_x2, (B2, in_feats), dtype=jnp.float32)
    out_bf16 = jax.block_until_ready(mlp_predictor(feats2, *params))
    ref2 = _reference(feats2, w1, b1, gamma, beta, w2, b2)
    assert out_bf16.shape == (B2, n_tasks)
    assert jnp.allclose(out_bf16, ref2, atol=3e-2, rtol=3e-2), \
        "bf16 mismatch (B=200)"

    print("KERNEL_OK")
</pallas_src>

<mosaic_0001>
module attributes {stable_mosaic.version = 11 : i64} {
  func.func @_mlp_predictor_kernel(%arg0: i32, %arg1: memref<8x32xf32, #tpu.memory_space<vmem>>, %arg2: memref<32x64xf32, #tpu.memory_space<vmem>>, %arg3: memref<1x64xf32, #tpu.memory_space<vmem>>, %arg4: memref<64x4xf32, #tpu.memory_space<vmem>>, %arg5: memref<1x4xf32, #tpu.memory_space<vmem>>, %arg6: memref<8x4xf32, #tpu.memory_space<vmem>>) attributes {dimension_semantics = [#tpu.dimension_semantics<parallel>], iteration_bounds = array<i64: 1>, scalar_prefetch = 0 : i64, scratch_operands = 0 : i64, tpu.core_type = #tpu.core_type<tc>, window_params = [{transform_indices = @transform_0, window_bounds = array<i64: 8, 32>}, {pipeline_mode = #tpu.pipeline_mode<synchronous>, transform_indices = @transform_1, window_bounds = array<i64: 32, 64>}, {pipeline_mode = #tpu.pipeline_mode<synchronous>, transform_indices = @transform_2, window_bounds = array<i64: 1, 64>}, {pipeline_mode = #tpu.pipeline_mode<synchronous>, transform_indices = @transform_3, window_bounds = array<i64: 64, 4>}, {pipeline_mode = #tpu.pipeline_mode<synchronous>, transform_indices = @transform_4, window_bounds = array<i64: 1, 4>}, {transform_indices = @transform_5, window_bounds = array<i64: 8, 4>}]} {
    %c0 = arith.constant 0 : index
    %c0_0 = arith.constant 0 : index
    %0 = vector.load %arg1[%c0, %c0_0] : memref<8x32xf32, #tpu.memory_space<vmem>>, vector<8x32xf32>
    %c0_1 = arith.constant 0 : index
    %c0_2 = arith.constant 0 : index
    %1 = vector.load %arg2[%c0_1, %c0_2] : memref<32x64xf32, #tpu.memory_space<vmem>>, vector<32x64xf32>
    %cst = arith.constant dense<0.000000e+00> : vector<8x64xf32>
    %2 = tpu.matmul %0, %1, %cst {dimension_numbers = #tpu.dot_dimension_numbers<[1], [0], [0], [1], [0, 0, 1, 1], [], []>} : vector<8x32xf32>, vector<32x64xf32>, vector<8x64xf32> -> vector<8x64xf32>
    %c0_3 = arith.constant 0 : index
    %c0_4 = arith.constant 0 : index
    %3 = vector.load %arg3[%c0_3, %c0_4] : memref<1x64xf32, #tpu.memory_space<vmem>>, vector<1x64xf32>
    %4 = vector.broadcast %3 : vector<1x64xf32> to vector<8x64xf32>
    %5 = arith.addf %2, %4 : vector<8x64xf32>
    %cst_5 = arith.constant 0.000000e+00 : f32
    %6 = vector.broadcast %cst_5 : f32 to vector<8x64xf32>
    %7 = arith.maximumf %5, %6 : vector<8x64xf32>
    %cst_6 = arith.constant dense<0.000000e+00> : vector<8xf32>
    %8 = vector.multi_reduction <add>, %7, %cst_6 [1] : vector<8x64xf32> to vector<8xf32>
    %9 = vector.shape_cast %8 : vector<8xf32> to vector<8x1xf32>
    %cst_7 = arith.constant 6.400000e+01 : f32
    %10 = vector.broadcast %cst_7 : f32 to vector<8x1xf32>
    %11 = arith.divf %9, %10 : vector<8x1xf32>
    %12 = vector.broadcast %11 : vector<8x1xf32> to vector<8x64xf32>
    %13 = arith.subf %7, %12 : vector<8x64xf32>
    %14 = arith.mulf %13, %13 : vector<8x64xf32>
    %cst_8 = arith.constant dense<0.000000e+00> : vector<8xf32>
    %15 = vector.multi_reduction <add>, %14, %cst_8 [1] : vector<8x64xf32> to vector<8xf32>
    %16 = vector.shape_cast %15 : vector<8xf32> to vector<8x1xf32>
    %cst_9 = arith.constant 6.400000e+01 : f32
    %17 = vector.broadcast %cst_9 : f32 to vector<8x1xf32>
    %18 = arith.divf %16, %17 : vector<8x1xf32>
    %cst_10 = arith.constant 9.99999974E-6 : f32
    %19 = vector.broadcast %cst_10 : f32 to vector<8x1xf32>
    %20 = arith.addf %18, %19 : vector<8x1xf32>
    %21 = math.rsqrt %20 : vector<8x1xf32>
    %22 = vector.broadcast %21 : vector<8x1xf32> to vector<8x64xf32>
    %23 = arith.mulf %13, %22 : vector<8x64xf32>
    %c0_11 = arith.constant 0 : index
    %c0_12 = arith.constant 0 : index
    %24 = vector.load %arg4[%c0_11, %c0_12] : memref<64x4xf32, #tpu.memory_space<vmem>>, vector<64x4xf32>
    %cst_13 = arith.constant dense<0.000000e+00> : vector<8x4xf32>
    %25 = tpu.matmul %23, %24, %cst_13 {dimension_numbers = #tpu.dot_dimension_numbers<[1], [0], [0], [1], [0, 0, 1, 1], [], []>} : vector<8x64xf32>, vector<64x4xf32>, vector<8x4xf32> -> vector<8x4xf32>
    %c0_14 = arith.constant 0 : index
    %c0_15 = arith.constant 0 : index
    %26 = vector.load %arg5[%c0_14, %c0_15] : memref<1x4xf32, #tpu.memory_space<vmem>>, vector<1x4xf32>
    %27 = vector.broadcast %26 : vector<1x4xf32> to vector<8x4xf32>
    %28 = arith.addf %25, %27 : vector<8x4xf32>
    %c0_16 = arith.constant 0 : index
    %c0_17 = arith.constant 0 : index
    %29 = vector.load %arg6[%c0_16, %c0_17] : memref<8x4xf32, #tpu.memory_space<vmem>>, vector<8x4xf32>
    tpu.vector_store %arg6[%c0_16, %c0_17], %28 {strides = array<i32>} : memref<8x4xf32, #tpu.memory_space<vmem>>, vector<8x4xf32>,
    return
  }
  func.func @transform_0(%arg0: i32) -> (i32, i32) {
    %c0_i32 = arith.constant 0 : i32
    %c0_i32_0 = arith.constant 0 : i32
    return %arg0, %c0_i32 : i32, i32
  }
  func.func @transform_1(%arg0: i32) -> (i32, i32) {
    %c0_i32 = arith.constant 0 : i32
    %c0_i32_0 = arith.constant 0 : i32
    %c0_i32_1 = arith.constant 0 : i32
    return %c0_i32, %c0_i32_0 : i32, i32
  }
  func.func @transform_2(%arg0: i32) -> (i32, i32) {
    %c0_i32 = arith.constant 0 : i32
    %c0_i32_0 = arith.constant 0 : i32
    %c0_i32_1 = arith.constant 0 : i32
    return %c0_i32, %c0_i32_0 : i32, i32
  }
  func.func @transform_3(%arg0: i32) -> (i32, i32) {
    %c0_i32 = arith.constant 0 : i32
    %c0_i32_0 = arith.constant 0 : i32
    %c0_i32_1 = arith.constant 0 : i32
    return %c0_i32, %c0_i32_0 : i32, i32
  }
  func.func @transform_4(%arg0: i32) -> (i32, i32) {
    %c0_i32 = arith.constant 0 : i32
    %c0_i32_0 = arith.constant 0 : i32
    %c0_i32_1 = arith.constant 0 : i32
    return %c0_i32, %c0_i32_0 : i32, i32
  }
  func.func @transform_5(%arg0: i32) -> (i32, i32) {
    %c0_i32 = arith.constant 0 : i32
    %c0_i32_0 = arith.constant 0 : i32
    return %arg0, %c0_i32 : i32, i32
  }
}

</mosaic_0001>

<bundles_post_ra>
// kernel: mlp_predictor.1
= control target key start
LH: loop header
LB: loop body
LE: loop exit
PB: predicated region body
PF: predicated region fallthrough
CT: control target
= control target key end

     0   :  { %v287_v0 = vmov 0.0|0.0   ;;  %vm288_vm0 = vmmov 0   ;;  %v289_v4 = vmov 0.0   ;;  %vm32_vm1 = vcmask 261120   ;;  %s371_s1 = inlined_call_operand.vmem [shape: f32[32,64], index: 1, kind: input, shape index: {}]   ;;  %s372_s0 = inlined_call_operand.vmem [shape: f32[8,32], index: 0, kind: input, shape index: {}]   ;;  %s373_s2 = inlined_call_operand.vmem [shape: f32[1,64], index: 2, kind: input, shape index: {}]   ;;  %s374_s3 = inlined_call_operand.vmem [shape: f32[64,4], index: 3, kind: input, shape index: {}]   ;;  %s375_s4 = inlined_call_operand.vmem [shape: f32[1,4], index: 4, kind: input, shape index: {}]   ;;  %s376_s5 = inlined_call_operand.vmem [shape: f32[8,4], index: 5, kind: output, shape index: {}]  }
   0x1   :  { %264 = vmatprep.subr.bf16.mxu0 %v287_v0  ;;  %v21_v1 = vld [vmem:[%s371_s1] sm:$0xff]  ;;  %v22_v2 = vld [vmem:[%s371_s1 + $0x8] sm:$0xff]  ;;  %v23_v3 = vld [vmem:[%s371_s1 + $0x10] sm:$0xff]  ;;  %242 = vmatprep.mubr.msk.f32.mxu0 %vm288_vm0, %v289_v4  ;;  %vm107_vm2 = vcmask 523264   ;;  %vm210_vm3 = vcmask 31744  }
   0x2   :  { %v265_v5 = vpack.c.bf16 %v22_v2, %v21_v1  ;;  %v24_v6 = vld [vmem:[%s371_s1 + $0x18] sm:$0xff]  ;;  %270 = vmatprep.subr.bf16.mxu1 %v287_v0  ;;  %261 = vmatprep.mubr.msk.f32.mxu1 %vm288_vm0, %v289_v4  ;;  %v20_v8 = vld [vmem:[%s372_s0] sm:$0xff]  ;;  %v123_v21 = vld [vmem:[%s374_s3 + $0x8] sm:$0xff] }
   0x3   :  { %v268_v7 = vpack.c.bf16 %v24_v6, %v23_v3  ;;  %v216_v9 = vld [vmem:[%s373_s2] ss:$0 sm:$0xff]  ;;  %v124_v23 = vld [vmem:[%s374_s3 + $0x10] sm:$0xff]  ;;  %v125_v24 = vld [vmem:[%s374_s3 + $0x18] sm:$0xff] }
   0x4   :  { %266 = vmatpush3.bf16.msra.mxu0 %v265_v5  ;;  %v122_v20 = vld [vmem:[%s374_s3] sm:$0xff]  ;;  %v274_v25 = vpack.c.bf16 %v125_v24, %v124_v23  ;;  %v127_v27 = vld [vmem:[%s374_s3 + $0x28] sm:$0xff]  ;;  %v128_v29 = vld [vmem:[%s374_s3 + $0x30] sm:$0xff] }
   0x5   :  { %267 = vmatprep.subr.bf16.mxu0 %v287_v0  ;;  %v271_v22 = vpack.c.bf16 %v123_v21, %v122_v20  ;;  %v126_v26 = vld [vmem:[%s374_s3 + $0x20] sm:$0xff]  ;;  %v129_v30 = vld [vmem:[%s374_s3 + $0x38] sm:$0xff] }
   0x6   :  { %v277_v28 = vpack.c.bf16 %v127_v27, %v126_v26  ;;  %v280_v31 = vpack.c.bf16 %v129_v30, %v128_v29  ;;  %v218_v37 = vld [vmem:[%s375_s4] ss:$0 sm:$0xff] }
   0x7   :  { %272 = vmatpush3.bf16.msra.mxu1 %v271_v22 }
   0x8   :  { %269 = vmatpush3.bf16.msra.mxu0 %v268_v7  ;;  %273 = vmatprep.subr.bf16.mxu1 %v287_v0 }
   0xb   :  { %243 = vmatmul.mubr.msk.f32.vlgmr.msra.gmra.mrb[0].mxu0 %vm32_vm1, %v20_v8  ;;  %275 = vmatpush3.bf16.msra.mxu1 %v274_v25 }
   0xc   :  { %276 = vmatprep.subr.bf16.mxu1 %v287_v0 }
   0xf   :  { %278 = vmatpush3.bf16.msra.mxu1 %v277_v28 }
  0x10   :  { %279 = vmatprep.subr.bf16.mxu1 %v287_v0 }
  0x13   :  { %281 = vmatpush3.bf16.msra.mxu1 %v280_v31 }
  0xde   :  { %v102_v10 = vpop.f32.mrb[0].mxu0 }
  0xdf   :  { %v103_v11 = vadd.f32 %v216_v9, %v102_v10  ;;  %v244_v12 = vpop.f32.mrb[1].mxu0 }
  0xe1   :  { %v106_v13 = vmax.f32 %v103_v11, 0.0 }
  0xe3   :  { %v108_v14 = vsel %vm107_vm2, %v106_v13, 0.0 }
  0xe4   :  { %109 = vadd.xlane.f32.xlu0 %v108_v14 }
 0x171   :  { %v110_v15 = vpop.xlane.xlu0 %109 }
 0x172   :  { %v112_v16 = vmul.f32 0.015625, %v110_v15 }
 0x174   :  { %v113_v17 = vsub.f32 %v106_v13, %v112_v16 }
 0x176   :  { %v114_v18 = vmul.f32 %v113_v17, %v113_v17 }
 0x178   :  { %v115_v19 = vsel %vm107_vm2, %v114_v18, 0.0 }
 0x179   :  { %116 = vadd.xlane.f32.xlu0 %v115_v19 }
 0x206   :  { %v117_v32 = vpop.xlane.xlu0 %116 }
 0x207   :  { %v118_v33 = vmul.f32 0.015625, %v117_v32 }
 0x209   :  { %v119_v34 = vadd.f32 1e-05, %v118_v33 }
 0x20b   :  { %285 = vrsqrt.f32 %v119_v34 }
 0x215   :  { %v286_v35 = vpop.eup %285 }
 0x216   :  { %v121_v36 = vmul.f32 %v286_v35, %v113_v17 }
 0x218   :  { %262 = vmatmul.mubr.msk.f32.vlgmr.msra.gmra.mrb[0].mxu1 %vm107_vm2, %v121_v36 }
 0x2eb   :  { %v206_v38 = vpop.f32.mrb[0].mxu1 }
 0x2ec   :  { %v207_v39 = vadd.f32 %v218_v37, %v206_v38  ;;  %v263_v40 = vpop.f32.mrb[1].mxu1 }
 0x2ee   :  { %211 = vst.msk [vmem:[%s376_s5] sm:$0xff] %vm210_vm3, %v207_v39 }

</bundles_post_ra>
